<compile_context>
chip_gen: v7x
topology: tpu7x:2x2x1
jax: 0.10.0
libtpu: 0.0.40
codegen_flags: <defaults>
</compile_context>

<pallas_src>
from typing import Any, Dict

import jax
import jax.numpy as jnp
from jax import lax
from jax.experimental import pallas as pl
from jax.experimental.pallas import tpu as pltpu


# ----------------------------------------------------------------------------
# Pallas kernel: fused discrete-bottleneck sequence block (one token tile)
#   x [blk, D] @ W [D, D], * mask     -> hidden h                (MXU, bf16)
#   h @ codebook^T                    -> logits                   (MXU, bf16)
#   softmax(logits)                   -> score                    (VPU, exact)
#   argmax(logits)                    -> id (lane-dense row)      (VPU + MXU)
#   score @ codebook, onehot @ codebook -> q_enc / q_dec          (MXU, bf16)
#   sum(valid * (h - q_dec)^2)        -> qloss partial per block
# ----------------------------------------------------------------------------
def _bottleneck_block_kernel(x_ref, mask_ref, valid_ref, w_ref, cb_ref,
                             logit_ref, score_ref, id_ref,
                             qenc_ref, qdec_ref, qloss_ref):
    x = x_ref[...]                                     # [blk, D] bf16
    w = w_ref[...]                                     # [D, D]  bf16 (resident)
    cb = cb_ref[...]                                   # [V, D]  bf16 (resident)
    mask = mask_ref[...]                               # [blk, 1] f32
    valid = valid_ref[...]                             # [blk, 1] f32 (0 on pad rows)

    # encoder projection; per-row attention mask applied AFTER the matmul
    # (matmul is linear per row, so identical to masking x, but avoids a
    #  masked bf16 copy of x and a bf16 VPU multiply — v5e has no bf16 VALU).
    h = jnp.dot(x, w, preferred_element_type=jnp.float32) * mask   # [blk, D] f32

    # logits = h @ cb^T, contracting last dims -> no materialized transpose
    logits = lax.dot_general(
        h.astype(jnp.bfloat16), cb,
        dimension_numbers=(((1,), (1,)), ((), ())),
        preferred_element_type=jnp.float32)                        # [blk, V] f32

    # exact softmax (score is user-facing and feeds the next model); the
    # reciprocal is per-row ([blk,1]) so the exact divide is cheap.
    m = jnp.max(logits, axis=-1, keepdims=True)
    e = jnp.exp(logits - m)
    denom = jnp.sum(e, axis=-1, keepdims=True)
    score = e * (1.0 / denom)                                      # [blk, V] f32

    # argmax ids (first occurrence on ties)
    vocab = logits.shape[-1]
    iota = lax.broadcasted_iota(jnp.int32, logits.shape, 1)
    ids_col = jnp.min(jnp.where(logits == m, iota, vocab), axis=-1,
                      keepdims=True)                               # [blk, 1] i32
    onehot = (iota == ids_col).astype(jnp.bfloat16)                # [blk, V] bf16

    # lane-dense id row via a tiny matvec against the one-hot (no sublane->lane
    # relayout; exact for V <= 256 since bf16 holds those integers exactly).
    # TODO(synk): for V >~ 1-2K replace one-hot matmuls with a per-row codebook
    # gather (DMA by id) — the one-hot matmul scales linearly with vocab.
    idx_row = lax.broadcasted_iota(jnp.int32, (1, vocab), 1).astype(jnp.bfloat16)
    ids_row = lax.dot_general(
        idx_row, onehot,
        dimension_numbers=(((1,), (1,)), ((), ())),
        preferred_element_type=jnp.float32)                        # [1, blk] f32

    # soft + hard quantization: two back-to-back dots against the SAME resident
    # codebook RHS (no [2*blk, V] concatenate temp).
    q_enc = jnp.dot(score.astype(jnp.bfloat16), cb,
                    preferred_element_type=jnp.float32)            # [blk, D] f32
    q_dec = jnp.dot(onehot, cb, preferred_element_type=jnp.float32)

    # commitment-style quantization loss partial; `valid` zeroes padded rows.
    # TODO(synk): forward-only — no stop-gradient split (needs custom VJP).
    diff = h - q_dec
    row_sq = jnp.sum(diff * diff, axis=-1, keepdims=True)          # [blk, 1]
    blk_sum = jnp.sum(row_sq * valid)

    logit_ref[...] = logits.astype(logit_ref.dtype)                # bf16 out
    score_ref[...] = score.astype(score_ref.dtype)                 # bf16 out
    id_ref[...] = ids_row.astype(jnp.int32)                        # [1, blk] i32
    qenc_ref[...] = q_enc
    qdec_ref[...] = q_dec
    qloss_ref[...] = jnp.full(qloss_ref.shape, blk_sum, jnp.float32)


# ----------------------------------------------------------------------------
# Tiling / VMEM budgeting helpers
# ----------------------------------------------------------------------------
_BLK_CANDIDATES = (2048, 1024, 512, 256, 128, 64, 32, 16)   # 16 = bf16 min sublane tile


def _block_vmem_bytes(blk: int, d: int, v: int) -> int:
    """Per-grid-step VMEM footprint (double-buffered IO + resident weights + temps)."""
    io_in = blk * (2 * d + 4 + 4)                            # x bf16, mask f32, valid f32
    io_out = blk * (2 * v + 2 * v + 4 + 4 * d + 4 * d) + 8 * 128 * 4
    weights = 2 * d * d + 2 * v * d                          # bf16, single-buffered
    temps = blk * (16 * d + 16 * v)                          # h/logits/e/score/onehot/q_*/diff
    return 2 * (io_in + io_out) + weights + temps


def _vmem_caps():
    """Generation-aware (tile budget, scoped vmem_limit_bytes)."""
    cap = None
    try:
        cap = getattr(pltpu.get_tpu_info(), "vmem_capacity_bytes", None)
    except Exception:
        cap = None
    if not cap:
        cap = 64 * 2**20                                     # conservative: v7x per-TC
    budget = int(0.30 * cap)                                 # tile-selection budget
    limit = int(min(0.55 * cap, 64 * 2**20))                 # ~35 MiB on v7x, 64 MiB on v5e/v6e
    return budget, limit


def _pick_tiling(n: int, d: int, v: int, budget: int):
    """Return (blk_n, padded_n). Pads n up if no candidate tile divides it."""
    fitting = [c for c in _BLK_CANDIDATES if _block_vmem_bytes(c, d, v) <= budget]
    if not fitting:
        fitting = [16]
    divisible = [c for c in fitting if n % c == 0]
    if divisible:
        # prefer an even grid with >= 4 steps (v7x: 2 TensorCores share the
        # 'parallel' axis) without dropping below 256-row tiles.
        for c in divisible:
            g = n // c
            if c >= 256 and g >= 4 and g % 2 == 0:
                return c, n
        return divisible[0], n
    # nothing divides n: pad up to a multiple of a fitting tile (waste <= ~12.5%)
    for c in fitting:
        padded = -(-n // c) * c
        if padded <= n + max(n // 8, 16):
            return c, padded
    c = fitting[-1]
    return c, -(-n // c) * c


def _resident_spec(shape):
    """BlockSpec for a constant-index (resident) operand; single-buffered if supported."""
    idx = lambda i: (0,) * len(shape)
    if hasattr(pl, "Buffered"):
        try:
            return pl.BlockSpec(shape, idx, pipeline_mode=pl.Buffered(1))
        except Exception:
            pass
    return pl.BlockSpec(shape, idx)


def bottleneck_block(x_2d: jax.Array, mask_2d: jax.Array,
                     w: jax.Array, cb: jax.Array):
    """x_2d: [N, D] bf16, mask_2d: [N, 1] f32, w: [D, D] bf16, cb: [V, D] bf16."""
    n, d = x_2d.shape
    v = cb.shape[0]
    budget, vmem_limit = _vmem_caps()
    blk_n, n_pad = _pick_tiling(n, d, v, budget)
    g = n_pad // blk_n

    valid_2d = jnp.ones((n, 1), jnp.float32)
    if n_pad != n:
        pad = n_pad - n
        x_2d = jnp.pad(x_2d, ((0, pad), (0, 0)))
        mask_2d = jnp.pad(mask_2d, ((0, pad), (0, 0)))
        valid_2d = jnp.pad(valid_2d, ((0, pad), (0, 0)))

    outs = pl.pallas_call(
        _bottleneck_block_kernel,
        out_shape=(
            jax.ShapeDtypeStruct((n_pad, v), jnp.bfloat16),   # logits (bf16 stream)
            jax.ShapeDtypeStruct((n_pad, v), jnp.bfloat16),   # score  (bf16 stream)
            jax.ShapeDtypeStruct((g, blk_n), jnp.int32),      # ids (lane-dense rows)
            jax.ShapeDtypeStruct((n_pad, d), jnp.float32),    # quantized (encoder)
            jax.ShapeDtypeStruct((n_pad, d), jnp.float32),    # quantized (decoder)
            jax.ShapeDtypeStruct((g, 8, 128), jnp.float32),   # qloss partials
        ),
        grid=(g,),
        in_specs=[
            pl.BlockSpec((blk_n, d), lambda i: (i, 0)),       # x tile
            pl.BlockSpec((blk_n, 1), lambda i: (i, 0)),       # attention mask tile
            pl.BlockSpec((blk_n, 1), lambda i: (i, 0)),       # validity tile
            _resident_spec((d, d)),                           # w (resident, 1x buffered)
            _resident_spec((v, d)),                           # codebook (resident, 1x)
        ],
        out_specs=(
            pl.BlockSpec((blk_n, v), lambda i: (i, 0)),
            pl.BlockSpec((blk_n, v), lambda i: (i, 0)),
            pl.BlockSpec((1, blk_n), lambda i: (i, 0)),
            pl.BlockSpec((blk_n, d), lambda i: (i, 0)),
            pl.BlockSpec((blk_n, d), lambda i: (i, 0)),
            pl.BlockSpec((1, 8, 128), lambda i: (i, 0, 0)),
        ),
        compiler_params=pltpu.CompilerParams(
            dimension_semantics=("parallel",),
            vmem_limit_bytes=vmem_limit),
    )(x_2d, mask_2d, valid_2d, w, cb)

    logits, score, ids, q_enc, q_dec, qloss_part = outs
    ids = ids.reshape(n_pad)[:n]
    if n_pad != n:
        logits, score = logits[:n], score[:n]
        q_enc, q_dec = q_enc[:n], q_dec[:n]
    qloss_sum = jnp.sum(qloss_part[:, 0, 0])   # tiny final reduce of per-block partials
    return logits, score, ids, q_enc, q_dec, qloss_sum


# ----------------------------------------------------------------------------
# Minimal discrete-bottleneck "sequence model" (parameters built in-script).
# ----------------------------------------------------------------------------
class BottleneckSeqModel:
    def __init__(self, key, hidden_dim: int, vocab_size: int, max_out_len: int):
        k_w, k_cb = jax.random.split(key)
        self.w = (jax.random.normal(k_w, (hidden_dim, hidden_dim), jnp.float32)
                  * 0.1).astype(jnp.bfloat16)
        self.codebook = jax.random.normal(
            k_cb, (vocab_size, hidden_dim), jnp.float32).astype(jnp.bfloat16)
        self.max_lengths = {"output": max_out_len}
        self.hidden_dim = hidden_dim
        self.vocab_size = vocab_size

    def __call__(self, *, input_embeds_enc, input_attention_mask=None,
                 max_output_length=None, **unused) -> Dict[str, Any]:
        b, s, d = input_embeds_enc.shape
        x_2d = input_embeds_enc.astype(jnp.bfloat16).reshape(b * s, d)
        if input_attention_mask is None:
            mask_2d = jnp.ones((b * s, 1), jnp.float32)
        else:
            mask_2d = input_attention_mask.astype(jnp.float32).reshape(b * s, 1)

        logits, score, ids, q_enc, q_dec, qloss_sum = bottleneck_block(
            x_2d, mask_2d, self.w, self.codebook)

        qloss = qloss_sum / jnp.float32(b * s * d)
        out_mask = jnp.ones((b, s), jnp.float32)  # all generated positions valid
        return {
            "id": ids.reshape(b, s),
            "score": score.reshape(b, s, self.vocab_size),
            "logit": logits.reshape(b, s, self.vocab_size),
            "quantized_vector_encoder": q_enc.reshape(b, s, d),
            "quantized_vector_decoder": q_dec.reshape(b, s, d),
            "output_attention_mask": out_mask,
            "quantization_loss": qloss,
        }


# ----------------------------------------------------------------------------
# BlocksConnector: x -> y -> z
# ----------------------------------------------------------------------------
class BlocksConnector:
    def __init__(self, model_x_to_y, model_y_to_z, config=None):
        self.config = config
        self.model_x_to_y = model_x_to_y
        self.model_y_to_z = model_y_to_z

    def transform_xy_outputs_to_y_inputs(self, xy_outputs: Dict[str, Any]) -> Dict[str, Any]:
        # Abstract in the reference (NotImplementedError); concrete pass-through
        # of the bottleneck vectors + mask, as any subclass would provide.
        return {
            "quantized_vector_encoder": xy_outputs["quantized_vector_encoder"],
            "output_attention_mask": xy_outputs["output_attention_mask"],
        }

    def forward(self, x_embeds_enc, x_attention_mask=None,
                teacher_force_z: bool = True,
                max_y_length: int = None, max_z_length: int = None) -> Dict[str, Any]:
        if max_y_length is None:
            max_y_length = self.model_x_to_y.max_lengths["output"]
        if max_z_length is None:
            max_z_length = self.model_y_to_z.max_lengths["output"]

        xy_outputs = self.model_x_to_y(
            input_embeds_enc=x_embeds_enc,
            input_attention_mask=x_attention_mask,
            max_output_length=max_y_length,
        )
        y_inputs = self.transform_xy_outputs_to_y_inputs(xy_outputs)

        # Reference line: q = q*mask[...,None] + (1-mask).detach()[...,None]*q
        # Forward value is exactly q (the .detach() only alters gradients), so
        # no kernel / HBM pass is emitted here.
        # TODO(synk): under autodiff this needs the stop-gradient blend restored.

        yz_outputs = self.model_y_to_z(
            input_embeds_enc=y_inputs["quantized_vector_encoder"],
            input_attention_mask=(y_inputs["output_attention_mask"] > 0),
            max_output_length=max_z_length,
            teacher_force_output=teacher_force_z,
        )

        quantization_loss = (xy_outputs["quantization_loss"]
                             + yz_outputs["quantization_loss"])
        return {
            "id_y": xy_outputs["id"],
            "id_z": yz_outputs["id"],
            "score_y": xy_outputs["score"],
            "score_z": yz_outputs["score"],
            "logit_y": xy_outputs["logit"],
            "logit_z": yz_outputs["logit"],
            "quantized_vector_encoder": yz_outputs["quantized_vector_encoder"],
            "quantized_vector_decoder": yz_outputs["quantized_vector_decoder"],
            "y_attention_mask": xy_outputs["output_attention_mask"],
            "z_attention_mask": yz_outputs["output_attention_mask"],
            "quantization_loss": quantization_loss,
        }


if __name__ == "__main__":
    # lane-dense toy sizes: D = V = 128 so every tile uses full 128-lane vregs
    B, S, D, V = 2, 8, 128, 128
    key = jax.random.PRNGKey(0)
    k_x, k_m1, k_m2 = jax.random.split(key, 3)

    x_embeds = jax.random.normal(k_x, (B, S, D), jnp.float32)
    x_mask = jnp.ones((B, S), jnp.float32)

    model_xy = BottleneckSeqModel(k_m1, hidden_dim=D, vocab_size=V, max_out_len=S)
    model_yz = BottleneckSeqModel(k_m2, hidden_dim=D, vocab_size=V, max_out_len=S)
    connector = BlocksConnector(model_xy, model_yz, config=None)

    out = connector.forward(x_embeds, x_attention_mask=x_mask)
    out = jax.block_until_ready(out)

    # light sanity checks
    assert out["logit_y"].shape == (B, S, V)
    assert out["logit_z"].shape == (B, S, V)
    assert out["score_y"].shape == (B, S, V)
    assert out["quantized_vector_encoder"].shape == (B, S, D)
    assert out["quantized_vector_decoder"].shape == (B, S, D)
    assert out["id_y"].dtype == jnp.int32 and out["id_y"].shape == (B, S)
    assert bool(jnp.all(jnp.isfinite(out["logit_y"].astype(jnp.float32))))
    assert bool(jnp.isfinite(out["quantization_loss"]))
    assert bool(jnp.all((out["id_y"] >= 0) & (out["id_y"] < V)))
    # softmax scores should sum to ~1 per token (bf16 output rounding tolerance)
    assert bool(jnp.allclose(out["score_y"].astype(jnp.float32).sum(-1), 1.0, atol=2e-2))

    print("KERNEL_OK")
</pallas_src>

<mosaic_0001>
module attributes {stable_mosaic.version = 11 : i64} {
  func.func @_bottleneck_block_kernel(%arg0: i32, %arg1: memref<16x128xbf16, #tpu.memory_space<vmem>>, %arg2: memref<16x1xf32, #tpu.memory_space<vmem>>, %arg3: memref<16x1xf32, #tpu.memory_space<vmem>>, %arg4: memref<128x128xbf16, #tpu.memory_space<vmem>>, %arg5: memref<128x128xbf16, #tpu.memory_space<vmem>>, %arg6: memref<16x128xbf16, #tpu.memory_space<vmem>>, %arg7: memref<16x128xbf16, #tpu.memory_space<vmem>>, %arg8: memref<1x16xi32, #tpu.memory_space<vmem>>, %arg9: memref<16x128xf32, #tpu.memory_space<vmem>>, %arg10: memref<16x128xf32, #tpu.memory_space<vmem>>, %arg11: memref<1x8x128xf32, #tpu.memory_space<vmem>>) attributes {dimension_semantics = [#tpu.dimension_semantics<parallel>], iteration_bounds = array<i64: 1>, scalar_prefetch = 0 : i64, scratch_operands = 0 : i64, tpu.core_type = #tpu.core_type<tc>, window_params = [{transform_indices = @transform_0, window_bounds = array<i64: 16, 128>}, {transform_indices = @transform_1, window_bounds = array<i64: 16, 1>}, {transform_indices = @transform_2, window_bounds = array<i64: 16, 1>}, {pipeline_mode = #tpu.pipeline_mode<synchronous>, transform_indices = @transform_3, window_bounds = array<i64: 128, 128>}, {pipeline_mode = #tpu.pipeline_mode<synchronous>, transform_indices = @transform_4, window_bounds = array<i64: 128, 128>}, {transform_indices = @transform_5, window_bounds = array<i64: 16, 128>}, {transform_indices = @transform_6, window_bounds = array<i64: 16, 128>}, {transform_indices = @transform_7, window_bounds = array<i64: 1, 16>}, {transform_indices = @transform_8, window_bounds = array<i64: 16, 128>}, {transform_indices = @transform_9, window_bounds = array<i64: 16, 128>}, {transform_indices = @transform_10, window_bounds = array<i64: 1, 8, 128>}]} {
    %c0 = arith.constant 0 : index
    %c0_0 = arith.constant 0 : index
    %0 = vector.load %arg1[%c0, %c0_0] : memref<16x128xbf16, #tpu.memory_space<vmem>>, vector<16x128xbf16>
    %c0_1 = arith.constant 0 : index
    %c0_2 = arith.constant 0 : index
    %1 = vector.load %arg4[%c0_1, %c0_2] : memref<128x128xbf16, #tpu.memory_space<vmem>>, vector<128x128xbf16>
    %c0_3 = arith.constant 0 : index
    %c0_4 = arith.constant 0 : index
    %2 = vector.load %arg5[%c0_3, %c0_4] : memref<128x128xbf16, #tpu.memory_space<vmem>>, vector<128x128xbf16>
    %c0_5 = arith.constant 0 : index
    %c0_6 = arith.constant 0 : index
    %3 = vector.load %arg2[%c0_5, %c0_6] : memref<16x1xf32, #tpu.memory_space<vmem>>, vector<16x1xf32>
    %c0_7 = arith.constant 0 : index
    %c0_8 = arith.constant 0 : index
    %4 = vector.load %arg3[%c0_7, %c0_8] : memref<16x1xf32, #tpu.memory_space<vmem>>, vector<16x1xf32>
    %cst = arith.constant dense<0.000000e+00> : vector<16x128xf32>
    %5 = tpu.matmul %0, %1, %cst {dimension_numbers = #tpu.dot_dimension_numbers<[1], [0], [0], [1], [0, 0, 1, 1], [], []>} : vector<16x128xbf16>, vector<128x128xbf16>, vector<16x128xf32> -> vector<16x128xf32>
    %6 = vector.broadcast %3 : vector<16x1xf32> to vector<16x128xf32>
    %7 = arith.mulf %5, %6 : vector<16x128xf32>
    %8 = arith.truncf %7 : vector<16x128xf32> to vector<16x128xbf16>
    %cst_9 = arith.constant dense<0.000000e+00> : vector<16x128xf32>
    %9 = tpu.matmul %8, %2, %cst_9 {dimension_numbers = #tpu.dot_dimension_numbers<[1], [1], [0], [0], [0, 0, 1, 0], [], []>} : vector<16x128xbf16>, vector<128x128xbf16>, vector<16x128xf32> -> vector<16x128xf32>
    %cst_10 = arith.constant dense<0xFF800000> : vector<16xf32>
    %10 = vector.multi_reduction <maximumf>, %9, %cst_10 [1] : vector<16x128xf32> to vector<16xf32>
    %11 = vector.shape_cast %10 : vector<16xf32> to vector<16x1xf32>
    %12 = vector.broadcast %11 : vector<16x1xf32> to vector<16x128xf32>
    %13 = arith.subf %9, %12 : vector<16x128xf32>
    %14 = math.exp %13 : vector<16x128xf32>
    %cst_11 = arith.constant dense<0.000000e+00> : vector<16xf32>
    %15 = vector.multi_reduction <add>, %14, %cst_11 [1] : vector<16x128xf32> to vector<16xf32>
    %16 = vector.shape_cast %15 : vector<16xf32> to vector<16x1xf32>
    %cst_12 = arith.constant 1.000000e+00 : f32
    %17 = vector.broadcast %cst_12 : f32 to vector<16x1xf32>
    %18 = arith.divf %17, %16 : vector<16x1xf32>
    %19 = vector.broadcast %18 : vector<16x1xf32> to vector<16x128xf32>
    %20 = arith.mulf %14, %19 : vector<16x128xf32>
    %21 = tpu.iota {dimensions = array<i32: 1>} : vector<16x128xi32>
    %22 = vector.broadcast %11 : vector<16x1xf32> to vector<16x128xf32>
    %23 = arith.cmpf oeq, %9, %22 : vector<16x128xf32>
    %c128_i32 = arith.constant 128 : i32
    %24 = vector.broadcast %c128_i32 : i32 to vector<16x128xi32>
    %25 = arith.select %23, %21, %24 : vector<16x128xi1>, vector<16x128xi32>
    %cst_13 = arith.constant dense<2147483647> : vector<16xi32>
    %26 = vector.multi_reduction <minsi>, %25, %cst_13 [1] : vector<16x128xi32> to vector<16xi32>
    %27 = vector.shape_cast %26 : vector<16xi32> to vector<16x1xi32>
    %28 = vector.broadcast %27 : vector<16x1xi32> to vector<16x128xi32>
    %29 = arith.cmpi eq, %21, %28 : vector<16x128xi32>
    %30 = arith.extui %29 : vector<16x128xi1> to vector<16x128xi32>
    %31 = arith.sitofp %30 : vector<16x128xi32> to vector<16x128xf32>
    %32 = arith.truncf %31 : vector<16x128xf32> to vector<16x128xbf16>
    %33 = tpu.iota {dimensions = array<i32: 1>} : vector<1x128xi32>
    %34 = arith.sitofp %33 : vector<1x128xi32> to vector<1x128xbf16>
    %cst_14 = arith.constant dense<0.000000e+00> : vector<1x16xf32>
    %35 = tpu.matmul %34, %32, %cst_14 {dimension_numbers = #tpu.dot_dimension_numbers<[1], [1], [0], [0], [0, 0, 1, 0], [], []>} : vector<1x128xbf16>, vector<16x128xbf16>, vector<1x16xf32> -> vector<1x16xf32>
    %36 = arith.truncf %20 : vector<16x128xf32> to vector<16x128xbf16>
    %cst_15 = arith.constant dense<0.000000e+00> : vector<16x128xf32>
    %37 = tpu.matmul %36, %2, %cst_15 {dimension_numbers = #tpu.dot_dimension_numbers<[1], [0], [0], [1], [0, 0, 1, 1], [], []>} : vector<16x128xbf16>, vector<128x128xbf16>, vector<16x128xf32> -> vector<16x128xf32>
    %cst_16 = arith.constant dense<0.000000e+00> : vector<16x128xf32>
    %38 = tpu.matmul %32, %2, %cst_16 {dimension_numbers = #tpu.dot_dimension_numbers<[1], [0], [0], [1], [0, 0, 1, 1], [], []>} : vector<16x128xbf16>, vector<128x128xbf16>, vector<16x128xf32> -> vector<16x128xf32>
    %39 = arith.subf %7, %38 : vector<16x128xf32>
    %40 = arith.mulf %39, %39 : vector<16x128xf32>
    %cst_17 = arith.constant dense<0.000000e+00> : vector<16xf32>
    %41 = vector.multi_reduction <add>, %40, %cst_17 [1] : vector<16x128xf32> to vector<16xf32>
    %42 = vector.shape_cast %41 : vector<16xf32> to vector<16x1xf32>
    %43 = arith.mulf %42, %4 : vector<16x1xf32>
    %44 = vector.shape_cast %43 : vector<16x1xf32> to vector<1x16x1xf32>
    %cst_18 = arith.constant dense<0.000000e+00> : vector<1xf32>
    %45 = vector.multi_reduction <add>, %44, %cst_18 [1, 2] : vector<1x16x1xf32> to vector<1xf32>
    %46 = vector.shape_cast %45 : vector<1xf32> to vector<1x1x1xf32>
    %47 = vector.extract %46[0, 0, 0] : f32 from vector<1x1x1xf32>
    %48 = arith.truncf %9 : vector<16x128xf32> to vector<16x128xbf16>
    %c0_19 = arith.constant 0 : index
    %c0_20 = arith.constant 0 : index
    %49 = vector.load %arg6[%c0_19, %c0_20] : memref<16x128xbf16, #tpu.memory_space<vmem>>, vector<16x128xbf16>
    tpu.vector_store %arg6[%c0_19, %c0_20], %48 {strides = array<i32>} : memref<16x128xbf16, #tpu.memory_space<vmem>>, vector<16x128xbf16>,
    %50 = arith.truncf %20 : vector<16x128xf32> to vector<16x128xbf16>
    %c0_21 = arith.constant 0 : index
    %c0_22 = arith.constant 0 : index
    %51 = vector.load %arg7[%c0_21, %c0_22] : memref<16x128xbf16, #tpu.memory_space<vmem>>, vector<16x128xbf16>
    tpu.vector_store %arg7[%c0_21, %c0_22], %50 {strides = array<i32>} : memref<16x128xbf16, #tpu.memory_space<vmem>>, vector<16x128xbf16>,
    %52 = arith.fptosi %35 : vector<1x16xf32> to vector<1x16xi32>
    %c0_23 = arith.constant 0 : index
    %c0_24 = arith.constant 0 : index
    %53 = vector.load %arg8[%c0_23, %c0_24] : memref<1x16xi32, #tpu.memory_space<vmem>>, vector<1x16xi32>
    tpu.vector_store %arg8[%c0_23, %c0_24], %52 {strides = array<i32>} : memref<1x16xi32, #tpu.memory_space<vmem>>, vector<1x16xi32>,
    %c0_25 = arith.constant 0 : index
    %c0_26 = arith.constant 0 : index
    %54 = vector.load %arg9[%c0_25, %c0_26] : memref<16x128xf32, #tpu.memory_space<vmem>>, vector<16x128xf32>
    tpu.vector_store %arg9[%c0_25, %c0_26], %37 {strides = array<i32>} : memref<16x128xf32, #tpu.memory_space<vmem>>, vector<16x128xf32>,
    %c0_27 = arith.constant 0 : index
    %c0_28 = arith.constant 0 : index
    %55 = vector.load %arg10[%c0_27, %c0_28] : memref<16x128xf32, #tpu.memory_space<vmem>>, vector<16x128xf32>
    tpu.vector_store %arg10[%c0_27, %c0_28], %38 {strides = array<i32>} : memref<16x128xf32, #tpu.memory_space<vmem>>, vector<16x128xf32>,
    %56 = vector.broadcast %47 : f32 to vector<1x8x128xf32>
    %c0_29 = arith.constant 0 : index
    %c0_30 = arith.constant 0 : index
    %c0_31 = arith.constant 0 : index
    %57 = vector.load %arg11[%c0_29, %c0_30, %c0_31] : memref<1x8x128xf32, #tpu.memory_space<vmem>>, vector<1x8x128xf32>
    tpu.vector_store %arg11[%c0_29, %c0_30, %c0_31], %56 {strides = array<i32>} : memref<1x8x128xf32, #tpu.memory_space<vmem>>, vector<1x8x128xf32>,
    return
  }
  func.func @transform_0(%arg0: i32) -> (i32, i32) {
    %c0_i32 = arith.constant 0 : i32
    %c0_i32_0 = arith.constant 0 : i32
    return %arg0, %c0_i32 : i32, i32
  }
  func.func @transform_1(%arg0: i32) -> (i32, i32) {
    %c0_i32 = arith.constant 0 : i32
    %c0_i32_0 = arith.constant 0 : i32
    return %arg0, %c0_i32 : i32, i32
  }
  func.func @transform_2(%arg0: i32) -> (i32, i32) {
    %c0_i32 = arith.constant 0 : i32
    %c0_i32_0 = arith.constant 0 : i32
    return %arg0, %c0_i32 : i32, i32
  }
  func.func @transform_3(%arg0: i32) -> (i32, i32) {
    %c0_i32 = arith.constant 0 : i32
    %c0_i32_0 = arith.constant 0 : i32
    %c0_i32_1 = arith.constant 0 : i32
    return %c0_i32, %c0_i32_0 : i32, i32
  }
  func.func @transform_4(%arg0: i32) -> (i32, i32) {
    %c0_i32 = arith.constant 0 : i32
    %c0_i32_0 = arith.constant 0 : i32
    %c0_i32_1 = arith.constant 0 : i32
    return %c0_i32, %c0_i32_0 : i32, i32
  }
  func.func @transform_5(%arg0: i32) -> (i32, i32) {
    %c0_i32 = arith.constant 0 : i32
    %c0_i32_0 = arith.constant 0 : i32
    return %arg0, %c0_i32 : i32, i32
  }
  func.func @transform_6(%arg0: i32) -> (i32, i32) {
    %c0_i32 = arith.constant 0 : i32
    %c0_i32_0 = arith.constant 0 : i32
    return %arg0, %c0_i32 : i32, i32
  }
  func.func @transform_7(%arg0: i32) -> (i32, i32) {
    %c0_i32 = arith.constant 0 : i32
    %c0_i32_0 = arith.constant 0 : i32
    return %arg0, %c0_i32 : i32, i32
  }
  func.func @transform_8(%arg0: i32) -> (i32, i32) {
    %c0_i32 = arith.constant 0 : i32
    %c0_i32_0 = arith.constant 0 : i32
    return %arg0, %c0_i32 : i32, i32
  }
  func.func @transform_9(%arg0: i32) -> (i32, i32) {
    %c0_i32 = arith.constant 0 : i32
    %c0_i32_0 = arith.constant 0 : i32
    return %arg0, %c0_i32 : i32, i32
  }
  func.func @transform_10(%arg0: i32) -> (i32, i32, i32) {
    %c0_i32 = arith.constant 0 : i32
    %c0_i32_0 = arith.constant 0 : i32
    %c0_i32_1 = arith.constant 0 : i32
    return %arg0, %c0_i32, %c0_i32_0 : i32, i32, i32
  }
}

</mosaic_0001>

<bundles_post_ra>
// kernel: tpu_custom_call.1
= control target key start
LH: loop header
LB: loop body
LE: loop exit
PB: predicated region body
PF: predicated region fallthrough
CT: control target
= control target key end

     0   :  { %16 = vsyncpa [#allocation3], 0  ;;  %s1320_s0 = inlined_call_operand.vmem [shape: bf16[16,128], index: 0, kind: input, shape index: {}]   ;;  %s1321_s1 = inlined_call_operand.vmem [shape: f32[16,1], index: 1, kind: input, shape index: {}]   ;;  %s1322_s2 = inlined_call_operand.vmem [shape: f32[16,1], index: 2, kind: input, shape index: {}]   ;;  %s1323_s3 = inlined_call_operand.hbm [shape: bf16[128,128], index: 3, kind: input, shape index: {}]   ;;  %s1324_s4 = inlined_call_operand.hbm [shape: bf16[128,128], index: 4, kind: input, shape index: {}]   ;;  %s1325_s5 = inlined_call_operand.hbm [shape: bf16[16,128], index: 5, kind: output, shape index: {0}]   ;;  %s1326_s6 = inlined_call_operand.hbm [shape: bf16[16,128], index: 6, kind: output, shape index: {1}]   ;;  %s1327_s7 = inlined_call_operand.hbm [shape: s32[1,16], index: 7, kind: output, shape index: {2}]   ;;  %s1328_s8 = inlined_call_operand.hbm [shape: f32[16,128], index: 8, kind: output, shape index: {3}]   ;;  %s1329_s9 = inlined_call_operand.hbm [shape: f32[16,128], index: 9, kind: output, shape index: {4}]   ;;  %s1330_s10 = inlined_call_operand.hbm [shape: f32[1,8,128], index: 10, kind: output, shape index: {5}]  }
   0x1   :  { %17 = vsyncpa [#allocation6], 0 }
   0x2   :  { %18 = vsyncpa [#allocation4], 0 }
   0x3   :  { %19 = vsyncpa [#allocation9], 0 }
   0x4   :  { %20 = vsyncpa [#allocation12], 0 }
   0x5   :  { %21 = vsyncpa [#allocation15], 0  ;;  %s1022_s13 = smov [#allocation2]   ;;  %s834_s17 = scalar_lea.hbm %s1323_s3, 1024 }
   0x6   :  { %s33_s14 = sshll.u32 %s1022_s13, 4  ;;  %p835_p0 = scmp.ne.s32.totalorder %s1323_s3, %s834_s17  ;;  %s34_s14 = int_to_ptr.vmem [resolvable:$true] %s33_s14 }
   0x7   :  { %p838_p1 = scmp.lt.u32.totalorder %s834_s17, %s1323_s3 }
   0x9   :  { %p840_p2 = pnand %p838_p1, %p835_p0 }
   0xb   :  { %843 = shalt.err (!%p840_p2)
}
   0xc   :  { %s844_s22 = scalar_lea.vmem %s34_s14, 1024  ;;  %p849_p4 = scmp.lt.s32.totalorder %s34_s14, %s34_s14 }
   0xd   :  { %p845_p3 = scmp.ne.s32.totalorder %s34_s14, %s844_s22  ;;  %p850_p5 = scmp.lt.s32.totalorder %s844_s22, %s844_s22 }
   0xf   :  { %p851_p6 = por %p850_p5, %p849_p4 }
  0x11   :  { %p852_p7 = pnand %p851_p6, %p845_p3 }
  0x13   :  { %855 = shalt.err (!%p852_p7)
}
  0x14   :  { %s1023_s23 = smov 64   ;;  %s1024_s24 = smov 4  }
  0x15   :  { %39 = dma.hbm_to_vmem [thread:$0]  %s1323_s3, 1024, %s34_s14, [#allocation3], %s1023_s23, %s1023_s23, %s1024_s24  }
  0x16   :  { %s1025_s27 = smov [#allocation5]   ;;  %s856_s11 = scalar_lea.hbm %s1324_s4, 1024 }
  0x17   :  { %s45_s28 = sshll.u32 %s1025_s27, 4  ;;  %p857_p8 = scmp.ne.s32.totalorder %s1324_s4, %s856_s11  ;;  %s46_s28 = int_to_ptr.vmem [resolvable:$true] %s45_s28 }
  0x18   :  { %p860_p9 = scmp.lt.u32.totalorder %s856_s11, %s1324_s4 }
  0x1a   :  { %p862_p10 = pnand %p860_p9, %p857_p8 }
  0x1c   :  { %865 = shalt.err (!%p862_p10)
}
  0x1d   :  { %s866_s17 = scalar_lea.vmem %s46_s28, 1024  ;;  %p871_p12 = scmp.lt.s32.totalorder %s46_s28, %s46_s28 }
  0x1e   :  { %p867_p11 = scmp.ne.s32.totalorder %s46_s28, %s866_s17  ;;  %p872_p13 = scmp.lt.s32.totalorder %s866_s17, %s866_s17 }
  0x20   :  { %p873_p0 = por %p872_p13, %p871_p12 }
  0x22   :  { %p874_p1 = pnand %p873_p0, %p867_p11 }
  0x24   :  { %877 = shalt.err (!%p874_p1)
}
  0x25   :  { %51 = dma.hbm_to_vmem [thread:$0]  %s1324_s4, 1024, %s46_s28, [#allocation6], %s1023_s23, %s1023_s23, %s1024_s24  }
  0x26   :  { %1010 = dma.done.wait [#allocation3], 1024  }
  0x27   :  { %1011 = vsyncadd [#allocation3], 4294966272 }
  0x28   :  { %1012 = dma.done.wait [#allocation6], 1024  }
  0x29   :  { %1013 = vsyncadd [#allocation6], 4294966272  ;;  %v1026_v0 = vmov 0.0   ;;  %vm1027_vm0 = vmmov 0   ;;  %v1028_v1 = vmov 0   ;;  %v809_v2 = vld [vmem:[#allocation2] sm:$0xff]   ;;  %v314_v35 = vlaneseq }
  0x2a   :  { %702 = vmatprep.subr.bf16.mxu0 %v1026_v0  ;;  %718 = vmatprep.mubr.msk.bf16.mxu0 %vm1027_vm0, %v1026_v0  ;;  %v810_v3 = vld [vmem:[#allocation2 + $0x8] sm:$0xff]   ;;  %v811_v4 = vld [vmem:[#allocation2 + $0x10] sm:$0xff]   ;;  %v812_v5 = vld [vmem:[#allocation2 + $0x18] sm:$0xff]   ;;  %vm490_vm8 = vcmask 7168   ;;  %vm523_vm9 = vcmask 122880   ;;  %s1030_s27 = smov [#allocation8]  }
  0x2b   :  { %808 = vset.pattern.permute.xlu0 %v1028_v1  ;;  %722 = vmatprep.subr.bf16.mxu1 %v1026_v0  ;;  %v93_v6 = vld [vmem:[%s1321_s1] sm:$0xff]  ;;  %v94_v8 = vld [vmem:[%s1321_s1 + $0x8] sm:$0xff]  ;;  %v815_v12 = vld [vmem:[#allocation2 + $0x30] sm:$0xff]   ;;  %v315_v36 = vand.u32 127, %v314_v35  ;;  %s548_s28 = sshll.u32 %s1030_s27, 4  ;;  %s1031_s29 = smov [#allocation11]   ;;  %s549_s28 = int_to_ptr.vmem [resolvable:$true] %s548_s28 }
  0x2c   :  { %738 = vmatprep.mubr.msk.bf16.mxu1 %vm1027_vm0, %v1026_v0  ;;  %703 = vmatpush3.bf16.msra.mxu0 %v809_v2  ;;  %v1134_v7 = vld [vmem:[#allocation5] sm:$0xff]   ;;  %v1143_v10 = vld [vmem:[#allocation5 + $0x8] sm:$0xff]   ;;  %v1149_v13 = vld [vmem:[#allocation5 + $0x10] sm:$0xff]   ;;  %s570_s30 = sshll.u32 %s1031_s29, 4  ;;  %p883_p3 = scmp.lt.s32.totalorder %s549_s28, %s549_s28  ;;  %s1229_s30 = int_to_ptr.vmem [resolvable:$true] %s570_s30 }
  0x2d   :  { %704 = vmatprep.subr.bf16.mxu0 %v1026_v0  ;;  %194 = vperm.xlu0 %808, %v93_v6   ;;  %v813_v9 = vld [vmem:[#allocation2 + $0x20] sm:$0xff]   ;;  %v814_v11 = vld [vmem:[#allocation2 + $0x28] sm:$0xff]   ;;  %v816_v14 = vld [vmem:[#allocation2 + $0x38] sm:$0xff]  }
  0x2e   :  { %723 = vmatpush3.bf16.xpose.msra.mxu1 %v1134_v7  ;;  %v817_v15 = vld [vmem:[%s1320_s0] sm:$0xff]   ;;  %v1158_v16 = vld [vmem:[#allocation5 + $0x18] sm:$0xff]   ;;  %v1168_v18 = vld [vmem:[#allocation5 + $0x28] sm:$0xff]  }
  0x2f   :  { %724 = vmatprep.subr.bf16.mxu1 %v1026_v0  ;;  %v1164_v17 = vld [vmem:[#allocation5 + $0x20] sm:$0xff]   ;;  %v1172_v19 = vld [vmem:[#allocation5 + $0x30] sm:$0xff]   ;;  %v1176_v20 = vld [vmem:[#allocation5 + $0x38] sm:$0xff]  }
  0x30   :  { %705 = vmatpush3.bf16.msra.mxu0 %v810_v3 }
  0x31   :  { %706 = vmatprep.subr.bf16.mxu0 %v1026_v0  ;;  %199 = vperm.xlu0 %808, %v94_v8   ;;  %v355_v8 = vcvt.s32.f32 %v315_v36 }
  0x34   :  { %707 = vmatpush3.bf16.msra.mxu0 %v811_v4 }
  0x35   :  { %708 = vmatprep.subr.bf16.mxu0 %v1026_v0 }
  0x36   :  { %725 = vmatpush3.bf16.xpose.msra.mxu1 %v1143_v10 }
  0x37   :  { %726 = vmatprep.subr.bf16.mxu1 %v1026_v0 }
  0x38   :  { %709 = vmatpush3.bf16.msra.mxu0 %v812_v5 }
  0x39   :  { %710 = vmatprep.subr.bf16.mxu0 %v1026_v0 }
  0x3c   :  { %711 = vmatpush3.bf16.msra.mxu0 %v813_v9  ;;  %v1029_v9 = vmov 1.0|1.0  }
  0x3d   :  { %712 = vmatprep.subr.bf16.mxu0 %v1026_v0 }
  0x3e   :  { %727 = vmatpush3.bf16.xpose.msra.mxu1 %v1149_v13 }
  0x3f   :  { %728 = vmatprep.subr.bf16.mxu1 %v1026_v0 }
  0x40   :  { %713 = vmatpush3.bf16.msra.mxu0 %v814_v11 }
  0x41   :  { %714 = vmatprep.subr.bf16.mxu0 %v1026_v0 }
  0x44   :  { %715 = vmatpush3.bf16.msra.mxu0 %v815_v12  ;;  %v356_v12 = vpack.c.bf16 %v355_v8, %v355_v8 }
  0x45   :  { %716 = vmatprep.subr.bf16.mxu0 %v1026_v0 }
  0x46   :  { %729 = vmatpush3.bf16.xpose.msra.mxu1 %v1158_v16 }
  0x47   :  { %730 = vmatprep.subr.bf16.mxu1 %v1026_v0 }
  0x48   :  { %717 = vmatpush3.bf16.msra.mxu0 %v816_v14 }
  0x49   :  { %742 = vmatprep.subr.bf16.mxu0 %v1026_v0 }
  0x4b   :  { %719 = vmatmul.mubr.bf16.vlgmr.msra.gmra.mrb[0].mxu0 %v817_v15 }
  0x4c   :  { %744 = vmatprep.mubr.msk.bf16.mxu0 %vm1027_vm0, %v1026_v0 }
  0x4e   :  { %731 = vmatpush3.bf16.xpose.msra.mxu1 %v1164_v17 }
  0x4f   :  { %732 = vmatprep.subr.bf16.mxu1 %v1026_v0 }
  0x56   :  { %733 = vmatpush3.bf16.xpose.msra.mxu1 %v1168_v18 }
  0x57   :  { %734 = vmatprep.subr.bf16.mxu1 %v1026_v0 }
  0x5e   :  { %735 = vmatpush3.bf16.xpose.msra.mxu1 %v1172_v19 }
  0x5f   :  { %736 = vmatprep.subr.bf16.mxu1 %v1026_v0 }
  0x66   :  { %737 = vmatpush3.bf16.xpose.msra.mxu1 %v1176_v20 }
  0x67   :  { %768 = vmatprep.subr.bf16.mxu1 %v1026_v0 }
  0xac   :  { %v195_v21 = vpop.permute.xlu0 %194 }
  0xb0   :  { %v200_v24 = vpop.permute.xlu0 %199 }
 0x11e   :  { %v185_v22 = vpop.f32.mrb[0].mxu0 }
 0x11f   :  { %v720_v23 = vpop.f32.mrb[1].mxu0  ;;  %v1180_v26 = vmul.f32 %v195_v21, %v185_v22 }
 0x120   :  { %v188_v25 = vpop.f32.mrb[2].mxu0 }
 0x121   :  { %v1182_v27 = vmul.f32 %v200_v24, %v188_v25  ;;  %v721_v28 = vpop.f32.mrb[3].mxu0 }
 0x123   :  { %v204_v29 = vpack.c.bf16 %v1182_v27, %v1180_v26 }
 0x125   :  { %739 = vmatmul.mubr.bf16.vlgmr.msra.gmra.mrb[0].mxu1 %v204_v29 }
 0x126   :  { %769 = vmatpush3.bf16.msra.mxu1 %v1134_v7  ;;  %784 = vmatprep.mubr.msk.bf16.mxu1 %vm1027_vm0, %v1026_v0 }
 0x127   :  { %770 = vmatprep.subr.bf16.mxu1 %v1026_v0 }
 0x12a   :  { %771 = vmatpush3.bf16.msra.mxu1 %v1143_v10 }
 0x12b   :  { %772 = vmatprep.subr.bf16.mxu1 %v1026_v0 }
 0x12e   :  { %773 = vmatpush3.bf16.msra.mxu1 %v1149_v13 }
 0x12f   :  { %774 = vmatprep.subr.bf16.mxu1 %v1026_v0 }
 0x132   :  { %775 = vmatpush3.bf16.msra.mxu1 %v1158_v16 }
 0x133   :  { %776 = vmatprep.subr.bf16.mxu1 %v1026_v0 }
 0x136   :  { %777 = vmatpush3.bf16.msra.mxu1 %v1164_v17 }
 0x137   :  { %778 = vmatprep.subr.bf16.mxu1 %v1026_v0 }
 0x13a   :  { %779 = vmatpush3.bf16.msra.mxu1 %v1168_v18 }
 0x13b   :  { %780 = vmatprep.subr.bf16.mxu1 %v1026_v0 }
 0x13e   :  { %781 = vmatpush3.bf16.msra.mxu1 %v1172_v19 }
 0x13f   :  { %782 = vmatprep.subr.bf16.mxu1 %v1026_v0 }
 0x142   :  { %783 = vmatpush3.bf16.msra.mxu1 %v1176_v20 }
 0x1f8   :  { %v287_v30 = vpop.f32.mrb[0].mxu1 }
 0x1f9   :  { %294 = vmax.xlane.f32.xlu1 %v287_v30  ;;  %v740_v31 = vpop.f32.mrb[1].mxu1 }
 0x1fa   :  { %v290_v32 = vpop.f32.mrb[2].mxu1 }
 0x1fb   :  { %v741_v33 = vpop.f32.mrb[3].mxu1  ;;  %v657_v34 = vpack.c.bf16 %v290_v32, %v287_v30 }
 0x1fc   :  { %v96_v33 = vld [vmem:[%s1322_s2 + $0x8] sm:$0xff] }
 0x1fd   :  { %296 = vmax.xlane.f32.xlu1 %v290_v32  ;;  %658 = vst [vmem:[#allocation7] sm:$0xff] %v657_v34  }
 0x286   :  { %v295_v37 = vpop.xlane.xlu1 %294 }
 0x287   :  { %v298_v38 = vsub.f32 %v287_v30, %v295_v37  ;;  %vm316_vm1 = vcmp.eq.f32.partialorder %v287_v30, %v295_v37 }
 0x288   :  { %v318_v39 = vsel %vm316_vm1, %v315_v36, 128 }
 0x289   :  { %v321_v40 = vshra.s32 %v318_v39, 16  ;;  %v300_v46 = vmul.f32 1.442695, %v298_v38  ;;  %v320_v48 = vand.u32 65535, %v318_v39 }
 0x28a   :  { %v297_v41 = vpop.xlane.xlu1 %296 }
 0x28b   :  { %vm317_vm2 = vcmp.eq.f32.partialorder %v290_v32, %v297_v41  ;;  %v323_v42 = vcvt.s32.f32 %v321_v40  ;;  %v299_v47 = vsub.f32 %v290_v32, %v297_v41  ;;  %826 = vpow2.f32 %v300_v46 }
 0x28c   :  { %v319_v43 = vsel %vm317_vm2, %v315_v36, 128  ;;  %v322_v51 = vcvt.s32.f32 %v320_v48 }
 0x28d   :  { %324 = vmin.xlane.f32.xlu0 %v323_v42  ;;  %v335_v44 = vshra.s32 %v319_v43, 16  ;;  %v302_v49 = vmul.f32 1.442695, %v299_v47  ;;  %v334_v52 = vand.u32 65535, %v319_v43 }
 0x28f   :  { %v337_v45 = vcvt.s32.f32 %v335_v44  ;;  %828 = vpow2.f32 %v302_v49  ;;  %v336_v55 = vcvt.s32.f32 %v334_v52 }
 0x291   :  { %338 = vmin.xlane.f32.xlu1 %v337_v45 }
 0x295   :  { %v827_v57 = vpop.eup %826 }
 0x299   :  { %v829_v58 = vpop.eup %828 }
 0x31a   :  { %v325_v50 = vpop.xlane.xlu0 %324 }
 0x31b   :  { %vm326_vm3 = vcmp.eq.f32.partialorder %v323_v42, %v325_v50  ;;  %v331_v59 = vcvt.f32.s32 %v325_v50 }
 0x31c   :  { %v327_v53 = vsel %vm326_vm3, %v322_v51, inf }
 0x31d   :  { %328 = vmin.xlane.f32.xlu1 %v327_v53  ;;  %v332_v63 = vshll.u32 %v331_v59, 16 }
 0x31e   :  { %v339_v54 = vpop.xlane.xlu1 %338 }
 0x31f   :  { %vm340_vm4 = vcmp.eq.f32.partialorder %v337_v45, %v339_v54  ;;  %v345_v61 = vcvt.f32.s32 %v339_v54 }
 0x320   :  { %v341_v56 = vsel %vm340_vm4, %v336_v55, inf }
 0x321   :  { %342 = vmin.xlane.f32.xlu1 %v341_v56  ;;  %v346_v2 = vshll.u32 %v345_v61, 16 }
 0x325   :  { %304 = vadd.xlane.f32.xlu1 %v827_v57 }
 0x329   :  { %306 = vadd.xlane.f32.xlu1 %v829_v58 }
 0x3aa   :  { %v329_v60 = vpop.xlane.xlu1 %328 }
 0x3ab   :  { %v330_v62 = vcvt.f32.s32 %v329_v60 }
 0x3ad   :  { %v333_v3 = vadd.s32 %v332_v63, %v330_v62 }
 0x3ae   :  { %v343_v1 = vpop.xlane.xlu1 %342 }
 0x3af   :  { %v344_v4 = vcvt.f32.s32 %v343_v1  ;;  %vm348_vm5 = vcmp.eq.s32.totalorder %v315_v36, %v333_v3 }
 0x3b1   :  { %v347_v5 = vadd.s32 %v346_v2, %v344_v4 }
 0x3b2   :  { %v305_v6 = vpop.xlane.xlu1 %304 }
 0x3b3   :  { %vm349_vm6 = vcmp.eq.s32.totalorder %v315_v36, %v347_v5  ;;  %830 = vrcp.f32 %v305_v6 }
 0x3b4   :  { %vm642_vm7 = vmpackc.low %vm349_vm6, %vm348_vm5 }
 0x3b5   :  { %743 = vmatpush3.bf16.xpose.msk.msra.mxu0 %vm642_vm7, %v1029_v9  ;;  %785 = vmatmul.mubr.msk.bf16.vlgmr.msra.gmra.mrb[4].mxu1 %vm642_vm7, %v1029_v9 }
 0x3b6   :  { %v307_v11 = vpop.xlane.xlu1 %306  ;;  %748 = vmatprep.subr.bf16.mxu0 %v1026_v0 }
 0x3b7   :  { %832 = vrcp.f32 %v307_v11 }
 0x3bc   :  { %745 = vmatmul.mubr.bf16.vlgmr.msra.gmra.mrb[4].mxu0 %v356_v12 }
 0x3bd   :  { %749 = vmatpush3.bf16.msra.mxu0 %v1134_v7  ;;  %764 = vmatprep.mubr.msk.bf16.mxu0 %vm1027_vm0, %v1026_v0  ;;  %v831_v14 = vpop.eup %830 }
 0x3be   :  { %750 = vmatprep.subr.bf16.mxu0 %v1026_v0  ;;  %v312_v21 = vmul.f32 %v831_v14, %v827_v57 }
 0x3c1   :  { %v833_v15 = vpop.eup %832  ;;  %751 = vmatpush3.bf16.msra.mxu0 %v1143_v10 }
 0x3c2   :  { %752 = vmatprep.subr.bf16.mxu0 %v1026_v0  ;;  %v313_v22 = vmul.f32 %v833_v15, %v829_v58 }
 0x3c4   :  { %v397_v23 = vpack.c.bf16 %v313_v22, %v312_v21 }
 0x3c5   :  { %753 = vmatpush3.bf16.msra.mxu0 %v1149_v13 }
 0x3c6   :  { %754 = vmatprep.subr.bf16.mxu0 %v1026_v0  ;;  %663 = vst [vmem:[#allocation8] sm:$0xff] %v397_v23  }
 0x3c9   :  { %755 = vmatpush3.bf16.msra.mxu0 %v1158_v16 }
 0x3ca   :  { %756 = vmatprep.subr.bf16.mxu0 %v1026_v0 }
 0x3cd   :  { %757 = vmatpush3.bf16.msra.mxu0 %v1164_v17 }
 0x3ce   :  { %758 = vmatprep.subr.bf16.mxu0 %v1026_v0 }
 0x3d1   :  { %759 = vmatpush3.bf16.msra.mxu0 %v1168_v18 }
 0x3d2   :  { %760 = vmatprep.subr.bf16.mxu0 %v1026_v0 }
 0x3d5   :  { %761 = vmatpush3.bf16.msra.mxu0 %v1172_v19 }
 0x3d6   :  { %762 = vmatprep.subr.bf16.mxu0 %v1026_v0 }
 0x3d9   :  { %763 = vmatpush3.bf16.msra.mxu0 %v1176_v20 }
 0x3dc   :  { %765 = vmatmul.mubr.bf16.vlgmr.msra.gmra.mrb[8].mxu0 %v397_v23 }
 0x488   :  { %v473_v7 = vpop.f32.mrb[4].mxu1 }
 0x489   :  { %v480_v10 = vsub.f32 %v1180_v26, %v473_v7  ;;  %527 = vst [vmem:[#allocation13] sm:$0xff] %v473_v7  ;;  %v786_v13 = vpop.f32.mrb[5].mxu1 }
 0x48a   :  { %v476_v16 = vpop.f32.mrb[6].mxu1 }
 0x48b   :  { %v481_v17 = vsub.f32 %v1182_v27, %v476_v16  ;;  %528 = vst [vmem:[#allocation13 + $0x8] sm:$0xff] %v476_v16  ;;  %v787_v24 = vpop.f32.mrb[7].mxu1  ;;  %v482_v18 = vmul.f32 %v480_v10, %v480_v10  ;;  %v95_v27 = vld [vmem:[%s1322_s2] sm:$0xff]  ;;  %s878_s2 = scalar_lea.vmem %s549_s28, 128 }
 0x48c   :  { %p879_p2 = scmp.ne.s32.totalorder %s549_s28, %s878_s2  ;;  %p884_p4 = scmp.lt.s32.totalorder %s878_s2, %s878_s2 }
 0x48d   :  { %484 = vadd.xlane.f32.xlu1 %v482_v18  ;;  %v483_v25 = vmul.f32 %v481_v17, %v481_v17 }
 0x48e   :  { %p885_p5 = por %p884_p4, %p883_p3 }
 0x48f   :  { %v391_v28 = vpop.f32.mrb[4].mxu0 }
 0x490   :  { %v746_v19 = vpop.f32.mrb[5].mxu0  ;;  %v790_v40 = vtrunc.f32 %v391_v28  ;;  %p886_p6 = pnand %p885_p5, %p879_p2 }
 0x491   :  { %486 = vadd.xlane.f32.xlu1 %v483_v25  ;;  %v394_v0 = vpop.f32.mrb[6].mxu0 }
 0x492   :  { %v747_v29 = vpop.f32.mrb[7].mxu0  ;;  %v791_v41 = vcvt.f32.s32 %v790_v40 }
 0x494   :  { %524 = vst.msk [vmem:[#allocation10] sm:$0x1] %vm523_vm9, %v791_v41 }
 0x4af   :  { %v432_v20 = vpop.f32.mrb[8].mxu0 }
 0x4b0   :  { %525 = vst [vmem:[#allocation11] sm:$0xff] %v432_v20  ;;  %v766_v30 = vpop.f32.mrb[9].mxu0 }
 0x4b1   :  { %v435_v31 = vpop.f32.mrb[10].mxu0 }
 0x4b2   :  { %526 = vst [vmem:[#allocation11 + $0x8] sm:$0xff] %v435_v31  ;;  %v767_v26 = vpop.f32.mrb[11].mxu0 }
 0x51a   :  { %v485_v32 = vpop.xlane.xlu1 %484 }
 0x51b   :  { %v488_v34 = vmul.f32 %v485_v32, %v95_v27 }
 0x51d   :  { %v491_v37 = vsel %vm490_vm8, %v488_v34, 0.0 }
 0x51e   :  { %v487_v35 = vpop.xlane.xlu1 %486 }
 0x51f   :  { %v489_v36 = vmul.f32 %v487_v35, %v96_v33 }
 0x521   :  { %v492_v38 = vsel %vm490_vm8, %v489_v36, 0.0 }
 0x522   :  { %v493_v39 = vadd.f32 %v492_v38, %v491_v37 }
 0x524   :  { %494 = vadd.xlane.f32.xlu1 %v493_v39 }
 0x525   :  { %889 = shalt.err (!%p886_p6)
}
 0x526   :  { %s890_s13 = scalar_lea.hbm %s1326_s6, 128 }
 0x527   :  { %p891_p7 = scmp.ne.s32.totalorder %s1326_s6, %s890_s13  ;;  %p894_p8 = scmp.lt.u32.totalorder %s890_s13, %s1326_s6 }
 0x529   :  { %p896_p9 = pnand %p894_p8, %p891_p7 }
 0x52b   :  { %899 = shalt.err (!%p896_p9)
}
 0x52c   :  { %554 = dma.vmem_to_hbm [thread:$0]  %s549_s28, 128, %s1326_s6, [#allocation9], %s1023_s23, %s1023_s23, %s1024_s24  }
 0x52d   :  { %s900_s18 = scalar_lea.vmem %s1229_s30, 256  ;;  %p905_p11 = scmp.lt.s32.totalorder %s1229_s30, %s1229_s30 }
 0x52e   :  { %p901_p10 = scmp.ne.s32.totalorder %s1229_s30, %s900_s18  ;;  %p906_p12 = scmp.lt.s32.totalorder %s900_s18, %s900_s18 }
 0x530   :  { %p907_p13 = por %p906_p12, %p905_p11 }
 0x532   :  { %p908_p0 = pnand %p907_p13, %p901_p10 }
 0x534   :  { %911 = shalt.err (!%p908_p0)
}
 0x535   :  { %s912_s1 = scalar_lea.hbm %s1328_s8, 256 }
 0x536   :  { %p913_p1 = scmp.ne.s32.totalorder %s1328_s8, %s912_s1  ;;  %p916_p2 = scmp.lt.u32.totalorder %s912_s1, %s1328_s8 }
 0x538   :  { %p918_p3 = pnand %p916_p2, %p913_p1 }
 0x53a   :  { %921 = shalt.err (!%p918_p3)
}
 0x53b   :  { %s1032_s6 = smov 128   ;;  %s1033_s26 = smov 8  }
 0x53c   :  { %576 = dma.vmem_to_hbm [thread:$0]  %s1229_s30, 256, %s1328_s8, [#allocation12], %s1032_s6, %s1032_s6, %s1033_s26  }
 0x53d   :  { %s1034_s29 = smov [#allocation7]   ;;  %s1035_s11 = smov [#allocation10]  }
 0x53e   :  { %s536_s2 = sshll.u32 %s1034_s29, 4  ;;  %s561_s12 = sshll.u32 %s1035_s11, 4  ;;  %s537_s2 = int_to_ptr.vmem [resolvable:$true] %s536_s2  ;;  %s562_s12 = int_to_ptr.vmem [resolvable:$true] %s561_s12 }
 0x53f   :  { %s922_s13 = scalar_lea.vmem %s537_s2, 128  ;;  %p927_p5 = scmp.lt.s32.totalorder %s537_s2, %s537_s2 }
 0x540   :  { %p923_p4 = scmp.ne.s32.totalorder %s537_s2, %s922_s13  ;;  %p928_p6 = scmp.lt.s32.totalorder %s922_s13, %s922_s13 }
 0x542   :  { %p929_p7 = por %p928_p6, %p927_p5 }
 0x544   :  { %p930_p8 = pnand %p929_p7, %p923_p4 }
 0x546   :  { %933 = shalt.err (!%p930_p8)
}
 0x547   :  { %s934_s17 = scalar_lea.hbm %s1325_s5, 128 }
 0x548   :  { %p935_p9 = scmp.ne.s32.totalorder %s1325_s5, %s934_s17  ;;  %p938_p10 = scmp.lt.u32.totalorder %s934_s17, %s1325_s5 }
 0x54a   :  { %p940_p11 = pnand %p938_p10, %p935_p9 }
 0x54c   :  { %943 = shalt.err (!%p940_p11)
}
 0x54d   :  { %542 = dma.vmem_to_hbm [thread:$0]  %s537_s2, 128, %s1325_s5, [#allocation4], %s1023_s23, %s1023_s23, %s1024_s24  }
 0x54e   :  { %s944_s19 = scalar_lea.vmem %s562_s12, 16  ;;  %s948_s20 = scalar_lea.vmem %s562_s12, 32 }
 0x54f   :  { %p945_p12 = scmp.ne.s32.totalorder %s562_s12, %s944_s19  ;;  %p949_p13 = scmp.lt.s32.totalorder %s562_s12, %s562_s12 }
 0x550   :  { %p950_p0 = scmp.lt.s32.totalorder %s948_s20, %s944_s19 }
 0x552   :  { %p951_p1 = por %p950_p0, %p949_p13 }
 0x554   :  { %p952_p2 = pnand %p951_p1, %p945_p12 }
 0x556   :  { %955 = shalt.err (!%p952_p2)
}
 0x557   :  { %s956_s0 = scalar_lea.hbm %s1327_s7, 16 }
 0x558   :  { %p957_p3 = scmp.ne.s32.totalorder %s1327_s7, %s956_s0  ;;  %p960_p4 = scmp.lt.u32.totalorder %s956_s0, %s1327_s7 }
 0x55a   :  { %p962_p5 = pnand %p960_p4, %p957_p3 }
 0x55c   :  { %965 = shalt.err (!%p962_p5)
}
 0x55d   :  { %564 = dma.vmem_to_hbm [thread:$0]  %s562_s12, 16, %s1327_s7, [#allocation9]  }
 0x55e   :  { %s1036_s24 = smov [#allocation13]  }
 0x55f   :  { %s582_s29 = sshll.u32 %s1036_s24, 4  ;;  %s583_s29 = int_to_ptr.vmem [resolvable:$true] %s582_s29 }
 0x560   :  { %s966_s2 = scalar_lea.vmem %s583_s29, 256  ;;  %p971_p7 = scmp.lt.s32.totalorder %s583_s29, %s583_s29 }
 0x561   :  { %p967_p6 = scmp.ne.s32.totalorder %s583_s29, %s966_s2  ;;  %p972_p8 = scmp.lt.s32.totalorder %s966_s2, %s966_s2 }
 0x563   :  { %p973_p9 = por %p972_p8, %p971_p7 }
 0x565   :  { %p974_p10 = pnand %p973_p9, %p967_p6 }
 0x567   :  { %977 = shalt.err (!%p974_p10)
}
 0x568   :  { %s978_s15 = scalar_lea.hbm %s1329_s9, 256 }
 0x569   :  { %p979_p11 = scmp.ne.s32.totalorder %s1329_s9, %s978_s15  ;;  %p982_p12 = scmp.lt.u32.totalorder %s978_s15, %s1329_s9 }
 0x56b   :  { %p984_p13 = pnand %p982_p12, %p979_p11 }
 0x56d   :  { %987 = shalt.err (!%p984_p13)
}
 0x56e   :  { %588 = dma.vmem_to_hbm [thread:$0]  %s583_s29, 256, %s1329_s9, [#allocation12], %s1032_s6, %s1032_s6, %s1033_s26  }
 0x56f   :  { %s1037_s8 = smov [#allocation14]  }
 0x570   :  { %s595_s30 = sshll.u32 %s1037_s8, 4  ;;  %s596_s30 = int_to_ptr.vmem [resolvable:$true] %s595_s30 }
 0x571   :  { %s988_s18 = scalar_lea.vmem %s596_s30, 128  ;;  %p993_p1 = scmp.lt.s32.totalorder %s596_s30, %s596_s30 }
 0x572   :  { %p989_p0 = scmp.ne.s32.totalorder %s596_s30, %s988_s18  ;;  %p994_p2 = scmp.lt.s32.totalorder %s988_s18, %s988_s18 }
 0x574   :  { %p995_p3 = por %p994_p2, %p993_p1 }
 0x576   :  { %p996_p4 = pnand %p995_p3, %p989_p0 }
 0x5b1   :  { %v495_v42 = vpop.xlane.xlu1 %494 }
 0x5b2   :  { %v496_v43 = vrot.slane %v495_v42, 4 }
 0x5b4   :  { %v497_v44 = vadd.f32 %v496_v43, %v495_v42 }
 0x5b6   :  { %v498_v45 = vrot.slane %v497_v44, 2 }
 0x5b8   :  { %v499_v46 = vadd.f32 %v498_v45, %v497_v44 }
 0x5ba   :  { %v500_v47 = vrot.slane %v499_v46, 1 }
 0x5bc   :  { %v501_v48 = vadd.f32 %v500_v47, %v499_v46 }
 0x5be   :  { %788 = vpush %v501_v48 }
 0x5ef   :  { %s789_s4 = spop %788 }
 0x5f0   :  { %v529_v49 = vstv %s789_s4 }
 0x5f1   :  { %530 = vst [vmem:[#allocation14] sm:$0xff] %v529_v49 }
 0x5f2   :  { %999 = shalt.err (!%p996_p4)
}
 0x5f3   :  { %s1000_s26 = scalar_lea.hbm %s1330_s10, 128 }
 0x5f4   :  { %p1001_p5 = scmp.ne.s32.totalorder %s1330_s10, %s1000_s26  ;;  %p1004_p6 = scmp.lt.u32.totalorder %s1000_s26, %s1330_s10 }
 0x5f6   :  { %p1006_p7 = pnand %p1004_p6, %p1001_p5 }
 0x5f8   :  { %1009 = shalt.err (!%p1006_p7)
}
 0x5f9   :  { %598 = dma.vmem_to_hbm [thread:$0]  %s596_s30, 128, %s1330_s10, [#allocation15]  }
 0x5fa   :  { %1014 = dma.done.wait [#allocation4], 128  }
 0x5fb   :  { %1015 = vsyncadd [#allocation4], 4294967168 }
 0x5fc   :  { %1016 = dma.done.wait [#allocation9], 144  }
 0x5fd   :  { %1017 = vsyncadd [#allocation9], 4294967152 }
 0x5fe   :  { %1018 = dma.done.wait [#allocation12], 512  }
 0x5ff   :  { %1019 = vsyncadd [#allocation12], 4294966784 }
 0x600   :  { %1020 = dma.done.wait [#allocation15], 128  }
 0x601   :  { %1021 = vsyncadd [#allocation15], 4294967168 }
 0x602   :  { %617 = vsyncpa [#allocation3], 1 }
 0x603   :  { %618 = vsyncpa [#allocation6], 1 }
 0x604   :  { %619 = vsyncpa [#allocation4], 1 }
 0x605   :  { %620 = vsyncpa [#allocation9], 1 }
 0x606   :  { %621 = vsyncpa [#allocation12], 1 }
 0x607   :  { %622 = vsyncpa [#allocation15], 1 }

</bundles_post_ra>
